<compile_context>
chip_gen: v5e
topology: v5e:2x2
jax: 0.10.0
libtpu: 0.0.40
codegen_flags: <defaults>
</compile_context>

<pallas_src>
import functools

import jax
import jax.numpy as jnp
from jax import lax
from jax.experimental import pallas as pl
from jax.experimental.pallas import tpu as pltpu

DROP_PROB = 0.3
LANE = 128              # TPU lane width: hidden/class dims padded to this
DEFAULT_TILE_B = 2048   # batch-tile rows per grid step (amortizes ~0.35us/step)
INNER_ROWS = 512        # sub-chunk rows inside a tile (bounds live ranges)


def _round_up(n, m):
    return ((n + m - 1) // m) * m


def _mlp_kernel(x_ref, w1_ref, b1_ref, w2_ref, b2_ref, w3_ref, b3_ref,
                *rest, training: bool, inner: int, n_inner: int):
    if training:
        keep_ref, o_ref = rest
    else:
        (o_ref,) = rest

    # Weights/biases are tiny and resident; load once per grid step (hoisted
    # out of the inner row loop).
    w1, b1 = w1_ref[...], b1_ref[...]
    w2, b2 = w2_ref[...], b2_ref[...]
    w3, b3 = w3_ref[...], b3_ref[...]

    def compute(r0):
        x = x_ref[pl.ds(r0, inner), :]

        # Linear(num_inputs, 5) + ReLU   (hidden dim zero-padded to 128 lanes)
        h1 = jnp.maximum(
            jnp.dot(x, w1, preferred_element_type=jnp.float32) + b1, 0.0)

        # Linear(5, 20) + ReLU           (hidden dim zero-padded to 128 lanes)
        h2 = jnp.maximum(
            jnp.dot(h1, w2, preferred_element_type=jnp.float32) + b2, 0.0)

        # Linear(20, num_classes). Padded class lanes carry b3 = -1e30, so
        # they get zero softmax mass with no per-step iota/where.
        logits = jnp.dot(h2, w3, preferred_element_type=jnp.float32) + b3

        if training:
            # Inverted dropout; keep mask streamed as uint8 {0,1}, padded
            # lanes are 1 so the -1e30 padding survives the multiply.
            keep = keep_ref[pl.ds(r0, inner), :].astype(jnp.float32)
            logits = logits * keep * (1.0 / (1.0 - DROP_PROB))

        # Softmax over dim=1 (class axis); exact normalization.
        m = jnp.max(logits, axis=1, keepdims=True)
        e = jnp.exp(logits - m)
        denom = jnp.sum(e, axis=1, keepdims=True)
        o_ref[pl.ds(r0, inner), :] = (e / denom).astype(o_ref.dtype)

    if n_inner == 1:
        compute(0)
    else:
        def body(c, carry):
            compute(pl.multiple_of(c * inner, inner))
            return carry
        lax.fori_loop(0, n_inner, body, 0, unroll=True)


def our_module_forward(x, params, *, training=False, dropout_key=None,
                       keep_mask=None, tile_b=DEFAULT_TILE_B,
                       out_dtype=jnp.float32):
    """Forward pass of OurModule.

    x: [B, num_inputs] float32.
    params: (w1 [ni,5], b1 [5], w2 [5,20], b2 [20], w3 [20,C], b3 [C]);
            weights stored as [in, out] (i.e. torch W.T).
    out_dtype: jnp.float32 (default, matches torch) or jnp.bfloat16 (halves
               the dominant padded output HBM stream).
    """
    w1, b1, w2, b2, w3, b3 = params
    B, ni = x.shape
    num_classes = w3.shape[1]
    h1p, h2p, cp = LANE, LANE, _round_up(num_classes, LANE)

    # ---- lane-dense padding of weights/biases (layout plumbing only) -------
    def pad_w(w, rows, cols):
        return jnp.pad(w.astype(jnp.float32),
                       ((0, rows - w.shape[0]), (0, cols - w.shape[1])))

    def pad_b(b, cols, pad_value=0.0):
        return jnp.pad(b.astype(jnp.float32), (0, cols - b.shape[0]),
                       constant_values=pad_value)[None, :]

    w1p, b1p = pad_w(w1, ni, h1p), pad_b(b1, h1p)
    w2p, b2p = pad_w(w2, h1p, h2p), pad_b(b2, h2p)
    # Padded class lanes get bias -1e30 -> zero softmax mass (mask baked in).
    w3p, b3p = pad_w(w3, h2p, cp), pad_b(b3, cp, pad_value=-1e30)

    # ---- batch tiling: 1-D grid over rows, fixed-size inner sub-chunks -----
    if B <= INNER_ROWS:
        tile_b = _round_up(B, 8)
        inner = tile_b
    else:
        inner = INNER_ROWS
        tile_b = max(inner, min(tile_b, _round_up(B, inner)))
        tile_b = _round_up(tile_b, inner)
    n_inner = tile_b // inner

    b_pad = _round_up(B, tile_b)
    # Even grid length so ("parallel",) splits the batch evenly across the
    # two TensorCores on v7x (costs at most one extra zero tile).
    if b_pad // tile_b >= 2:
        b_pad = _round_up(b_pad, 2 * tile_b)
    grid = (b_pad // tile_b,)

    x_p = jnp.pad(x.astype(jnp.float32), ((0, b_pad - B), (0, 0)))

    row_spec_in = pl.BlockSpec((tile_b, ni), lambda i: (i, 0))
    row_spec_out = pl.BlockSpec((tile_b, cp), lambda i: (i, 0))
    full = lambda shape: pl.BlockSpec(shape, lambda i: (0, 0))

    in_specs = [row_spec_in,
                full((ni, h1p)), full((1, h1p)),
                full((h1p, h2p)), full((1, h2p)),
                full((h2p, cp)), full((1, cp))]
    args = [x_p, w1p, b1p, w2p, b2p, w3p, b3p]

    if training:
        if keep_mask is None:
            if dropout_key is None:
                dropout_key = jax.random.PRNGKey(0)
            keep_mask = jax.random.bernoulli(
                dropout_key, 1.0 - DROP_PROB, (B, num_classes))
        # uint8 mask; padded lanes/rows = 1 so they never zero the -1e30 pad.
        keep_p = jnp.pad(keep_mask.astype(jnp.uint8),
                         ((0, b_pad - B), (0, cp - num_classes)),
                         constant_values=1)
        in_specs.append(pl.BlockSpec((tile_b, cp), lambda i: (i, 0)))
        args.append(keep_p)

    # VMEM budget: double-buffered x / out / mask streams + resident weights
    # + per-sub-chunk intermediates.
    out_itemsize = jnp.dtype(out_dtype).itemsize
    bytes_per_row = ni * 4 + cp * out_itemsize + (cp if training else 0)
    vmem_need = 2 * tile_b * bytes_per_row
    vmem_need += 2 * 4 * (ni * h1p + h1p * h2p + h2p * cp + h1p + h2p + cp)
    vmem_need += 6 * inner * LANE * 4
    vmem_limit = int(min(100 << 20, max(32 << 20, vmem_need * 3 // 2)))

    kernel = functools.partial(_mlp_kernel, training=training,
                               inner=inner, n_inner=n_inner)

    out = pl.pallas_call(
        kernel,
        out_shape=jax.ShapeDtypeStruct((b_pad, cp), out_dtype),
        grid=grid,
        in_specs=in_specs,
        out_specs=row_spec_out,
        compiler_params=pltpu.CompilerParams(
            dimension_semantics=("parallel",),  # megacore batch split
            vmem_limit_bytes=vmem_limit),
    )(*args)

    return out[:B, :num_classes]


def init_params(key, num_inputs, num_classes):
    """Deterministic init mirroring the PyTorch Linear shapes.
    Weights stored as [in, out] (torch W.T), biases as [out]."""
    ks = jax.random.split(key, 6)

    def linear(kw, kb, fan_in, fan_out):
        bound = 1.0 / (fan_in ** 0.5)
        w = jax.random.uniform(kw, (fan_in, fan_out), jnp.float32, -bound, bound)
        b = jax.random.uniform(kb, (fan_out,), jnp.float32, -bound, bound)
        return w, b

    w1, b1 = linear(ks[0], ks[1], num_inputs, 5)
    w2, b2 = linear(ks[2], ks[3], 5, 20)
    w3, b3 = linear(ks[4], ks[5], 20, num_classes)
    return (w1, b1, w2, b2, w3, b3)


def _reference(x, params, keep_mask=None):
    """Pure-JAX reference (keep_mask=None -> eval mode: dropout = identity)."""
    w1, b1, w2, b2, w3, b3 = params
    h1 = jnp.maximum(x @ w1 + b1, 0.0)
    h2 = jnp.maximum(h1 @ w2 + b2, 0.0)
    logits = h2 @ w3 + b3
    if keep_mask is not None:
        logits = logits * keep_mask * (1.0 / (1.0 - DROP_PROB))
    return jax.nn.softmax(logits, axis=1)


if __name__ == "__main__":
    num_inputs, num_classes, batch = 32, 10, 8

    key = jax.random.PRNGKey(0)
    kx, kp, kd, kx2 = jax.random.split(key, 4)
    x = jax.random.normal(kx, (batch, num_inputs), dtype=jnp.float32)
    params = init_params(kp, num_inputs, num_classes)

    # Eval mode (deterministic; dropout is identity, as in module.eval()).
    out = jax.block_until_ready(our_module_forward(x, params, training=False))
    ref = _reference(x, params)
    assert out.shape == (batch, num_classes)
    assert jnp.allclose(out, ref, atol=1e-3, rtol=1e-3), "eval mismatch vs reference"
    assert jnp.allclose(jnp.sum(out, axis=1), 1.0, atol=1e-3), "softmax rows must sum to 1"

    # Training mode (inverted dropout with an explicit keep mask, vs reference).
    keep = jax.random.bernoulli(kd, 1.0 - DROP_PROB,
                                (batch, num_classes)).astype(jnp.float32)
    out_tr = jax.block_until_ready(
        our_module_forward(x, params, training=True, keep_mask=keep))
    ref_tr = _reference(x, params, keep_mask=keep)
    assert out_tr.shape == (batch, num_classes)
    assert jnp.allclose(out_tr, ref_tr, atol=1e-3, rtol=1e-3), "train mismatch vs reference"
    assert jnp.allclose(jnp.sum(out_tr, axis=1), 1.0, atol=1e-3), "softmax rows must sum to 1"

    # Larger batch: exercises the multi-sub-chunk (fori_loop) path.
    x_big = jax.random.normal(kx2, (600, num_inputs), dtype=jnp.float32)
    out_big = jax.block_until_ready(our_module_forward(x_big, params, training=False))
    ref_big = _reference(x_big, params)
    assert out_big.shape == (600, num_classes)
    assert jnp.allclose(out_big, ref_big, atol=1e-3, rtol=1e-3), "large-batch mismatch"
    assert jnp.allclose(jnp.sum(out_big, axis=1), 1.0, atol=1e-3), "softmax rows must sum to 1"

    # bf16 output path (halves the dominant output HBM stream; looser tolerance).
    out_bf16 = jax.block_until_ready(
        our_module_forward(x, params, training=False, out_dtype=jnp.bfloat16))
    assert out_bf16.dtype == jnp.bfloat16
    assert jnp.allclose(out_bf16.astype(jnp.float32), ref, atol=1e-2, rtol=2e-2), \
        "bf16 eval mismatch vs reference"
    assert jnp.allclose(jnp.sum(out_bf16.astype(jnp.float32), axis=1), 1.0, atol=3e-2), \
        "bf16 softmax rows must sum to ~1"

    print("KERNEL_OK")
</pallas_src>

<mosaic_0001>
module attributes {stable_mosaic.version = 11 : i64} {
  func.func @_mlp_kernel(%arg0: i32, %arg1: memref<8x32xf32, #tpu.memory_space<vmem>>, %arg2: memref<32x128xf32, #tpu.memory_space<vmem>>, %arg3: memref<1x128xf32, #tpu.memory_space<vmem>>, %arg4: memref<128x128xf32, #tpu.memory_space<vmem>>, %arg5: memref<1x128xf32, #tpu.memory_space<vmem>>, %arg6: memref<128x128xf32, #tpu.memory_space<vmem>>, %arg7: memref<1x128xf32, #tpu.memory_space<vmem>>, %arg8: memref<8x128xf32, #tpu.memory_space<vmem>>) attributes {dimension_semantics = [#tpu.dimension_semantics<parallel>], iteration_bounds = array<i64: 1>, scalar_prefetch = 0 : i64, scratch_operands = 0 : i64, tpu.core_type = #tpu.core_type<tc>, window_params = [{transform_indices = @transform_0, window_bounds = array<i64: 8, 32>}, {pipeline_mode = #tpu.pipeline_mode<synchronous>, transform_indices = @transform_1, window_bounds = array<i64: 32, 128>}, {pipeline_mode = #tpu.pipeline_mode<synchronous>, transform_indices = @transform_2, window_bounds = array<i64: 1, 128>}, {pipeline_mode = #tpu.pipeline_mode<synchronous>, transform_indices = @transform_3, window_bounds = array<i64: 128, 128>}, {pipeline_mode = #tpu.pipeline_mode<synchronous>, transform_indices = @transform_4, window_bounds = array<i64: 1, 128>}, {pipeline_mode = #tpu.pipeline_mode<synchronous>, transform_indices = @transform_5, window_bounds = array<i64: 128, 128>}, {pipeline_mode = #tpu.pipeline_mode<synchronous>, transform_indices = @transform_6, window_bounds = array<i64: 1, 128>}, {transform_indices = @transform_7, window_bounds = array<i64: 8, 128>}]} {
    %c0 = arith.constant 0 : index
    %c0_0 = arith.constant 0 : index
    %0 = vector.load %arg2[%c0, %c0_0] : memref<32x128xf32, #tpu.memory_space<vmem>>, vector<32x128xf32>
    %c0_1 = arith.constant 0 : index
    %c0_2 = arith.constant 0 : index
    %1 = vector.load %arg3[%c0_1, %c0_2] : memref<1x128xf32, #tpu.memory_space<vmem>>, vector<1x128xf32>
    %c0_3 = arith.constant 0 : index
    %c0_4 = arith.constant 0 : index
    %2 = vector.load %arg4[%c0_3, %c0_4] : memref<128x128xf32, #tpu.memory_space<vmem>>, vector<128x128xf32>
    %c0_5 = arith.constant 0 : index
    %c0_6 = arith.constant 0 : index
    %3 = vector.load %arg5[%c0_5, %c0_6] : memref<1x128xf32, #tpu.memory_space<vmem>>, vector<1x128xf32>
    %c0_7 = arith.constant 0 : index
    %c0_8 = arith.constant 0 : index
    %4 = vector.load %arg6[%c0_7, %c0_8] : memref<128x128xf32, #tpu.memory_space<vmem>>, vector<128x128xf32>
    %c0_9 = arith.constant 0 : index
    %c0_10 = arith.constant 0 : index
    %5 = vector.load %arg7[%c0_9, %c0_10] : memref<1x128xf32, #tpu.memory_space<vmem>>, vector<1x128xf32>
    %c0_11 = arith.constant 0 : index
    %c0_12 = arith.constant 0 : index
    %6 = vector.load %arg1[%c0_11, %c0_12] : memref<8x32xf32, #tpu.memory_space<vmem>>, vector<8x32xf32>
    %cst = arith.constant dense<0.000000e+00> : vector<8x128xf32>
    %7 = tpu.matmul %6, %0, %cst {dimension_numbers = #tpu.dot_dimension_numbers<[1], [0], [0], [1], [0, 0, 1, 1], [], []>} : vector<8x32xf32>, vector<32x128xf32>, vector<8x128xf32> -> vector<8x128xf32>
    %8 = vector.broadcast %1 : vector<1x128xf32> to vector<8x128xf32>
    %9 = arith.addf %7, %8 : vector<8x128xf32>
    %cst_13 = arith.constant 0.000000e+00 : f32
    %10 = vector.broadcast %cst_13 : f32 to vector<8x128xf32>
    %11 = arith.maximumf %9, %10 : vector<8x128xf32>
    %cst_14 = arith.constant dense<0.000000e+00> : vector<8x128xf32>
    %12 = tpu.matmul %11, %2, %cst_14 {dimension_numbers = #tpu.dot_dimension_numbers<[1], [0], [0], [1], [0, 0, 1, 1], [], []>} : vector<8x128xf32>, vector<128x128xf32>, vector<8x128xf32> -> vector<8x128xf32>
    %13 = vector.broadcast %3 : vector<1x128xf32> to vector<8x128xf32>
    %14 = arith.addf %12, %13 : vector<8x128xf32>
    %cst_15 = arith.constant 0.000000e+00 : f32
    %15 = vector.broadcast %cst_15 : f32 to vector<8x128xf32>
    %16 = arith.maximumf %14, %15 : vector<8x128xf32>
    %cst_16 = arith.constant dense<0.000000e+00> : vector<8x128xf32>
    %17 = tpu.matmul %16, %4, %cst_16 {dimension_numbers = #tpu.dot_dimension_numbers<[1], [0], [0], [1], [0, 0, 1, 1], [], []>} : vector<8x128xf32>, vector<128x128xf32>, vector<8x128xf32> -> vector<8x128xf32>
    %18 = vector.broadcast %5 : vector<1x128xf32> to vector<8x128xf32>
    %19 = arith.addf %17, %18 : vector<8x128xf32>
    %cst_17 = arith.constant dense<0xFF800000> : vector<8xf32>
    %20 = vector.multi_reduction <maximumf>, %19, %cst_17 [1] : vector<8x128xf32> to vector<8xf32>
    %21 = vector.shape_cast %20 : vector<8xf32> to vector<8x1xf32>
    %22 = vector.broadcast %21 : vector<8x1xf32> to vector<8x128xf32>
    %23 = arith.subf %19, %22 : vector<8x128xf32>
    %24 = math.exp %23 : vector<8x128xf32>
    %cst_18 = arith.constant dense<0.000000e+00> : vector<8xf32>
    %25 = vector.multi_reduction <add>, %24, %cst_18 [1] : vector<8x128xf32> to vector<8xf32>
    %26 = vector.shape_cast %25 : vector<8xf32> to vector<8x1xf32>
    %27 = vector.broadcast %26 : vector<8x1xf32> to vector<8x128xf32>
    %28 = arith.divf %24, %27 : vector<8x128xf32>
    %c0_19 = arith.constant 0 : index
    %c0_20 = arith.constant 0 : index
    %29 = vector.load %arg8[%c0_19, %c0_20] : memref<8x128xf32, #tpu.memory_space<vmem>>, vector<8x128xf32>
    tpu.vector_store %arg8[%c0_19, %c0_20], %28 {strides = array<i32>} : memref<8x128xf32, #tpu.memory_space<vmem>>, vector<8x128xf32>,
    return
  }
  func.func @transform_0(%arg0: i32) -> (i32, i32) {
    %c0_i32 = arith.constant 0 : i32
    %c0_i32_0 = arith.constant 0 : i32
    return %arg0, %c0_i32 : i32, i32
  }
  func.func @transform_1(%arg0: i32) -> (i32, i32) {
    %c0_i32 = arith.constant 0 : i32
    %c0_i32_0 = arith.constant 0 : i32
    %c0_i32_1 = arith.constant 0 : i32
    return %c0_i32, %c0_i32_0 : i32, i32
  }
  func.func @transform_2(%arg0: i32) -> (i32, i32) {
    %c0_i32 = arith.constant 0 : i32
    %c0_i32_0 = arith.constant 0 : i32
    %c0_i32_1 = arith.constant 0 : i32
    return %c0_i32, %c0_i32_0 : i32, i32
  }
  func.func @transform_3(%arg0: i32) -> (i32, i32) {
    %c0_i32 = arith.constant 0 : i32
    %c0_i32_0 = arith.constant 0 : i32
    %c0_i32_1 = arith.constant 0 : i32
    return %c0_i32, %c0_i32_0 : i32, i32
  }
  func.func @transform_4(%arg0: i32) -> (i32, i32) {
    %c0_i32 = arith.constant 0 : i32
    %c0_i32_0 = arith.constant 0 : i32
    %c0_i32_1 = arith.constant 0 : i32
    return %c0_i32, %c0_i32_0 : i32, i32
  }
  func.func @transform_5(%arg0: i32) -> (i32, i32) {
    %c0_i32 = arith.constant 0 : i32
    %c0_i32_0 = arith.constant 0 : i32
    %c0_i32_1 = arith.constant 0 : i32
    return %c0_i32, %c0_i32_0 : i32, i32
  }
  func.func @transform_6(%arg0: i32) -> (i32, i32) {
    %c0_i32 = arith.constant 0 : i32
    %c0_i32_0 = arith.constant 0 : i32
    %c0_i32_1 = arith.constant 0 : i32
    return %c0_i32, %c0_i32_0 : i32, i32
  }
  func.func @transform_7(%arg0: i32) -> (i32, i32) {
    %c0_i32 = arith.constant 0 : i32
    %c0_i32_0 = arith.constant 0 : i32
    return %arg0, %c0_i32 : i32, i32
  }
}

</mosaic_0001>

<bundles_post_ra>
// kernel: tpu_custom_call.1
= control target key start
LH: loop header
LB: loop body
LE: loop exit
PB: predicated region body
PF: predicated region fallthrough
CT: control target
= control target key end

     0   :  { %12 = vsyncpa [#allocation3], 0  ;;  %s459_s0 = inlined_call_operand.hbm [shape: f32[8,32], index: 0, kind: input, shape index: {}]   ;;  %s460_s1 = inlined_call_operand.hbm [shape: f32[32,128], index: 1, kind: input, shape index: {}]   ;;  %s461_s2 = inlined_call_operand.vmem [shape: f32[1,128], index: 2, kind: input, shape index: {}]   ;;  %s462_s3 = inlined_call_operand.hbm [shape: f32[128,128], index: 3, kind: input, shape index: {}]   ;;  %s463_s4 = inlined_call_operand.vmem [shape: f32[1,128], index: 4, kind: input, shape index: {}]   ;;  %s464_s5 = inlined_call_operand.hbm [shape: f32[128,128], index: 5, kind: input, shape index: {}]   ;;  %s465_s6 = inlined_call_operand.vmem [shape: f32[1,128], index: 6, kind: input, shape index: {}]   ;;  %s466_s7 = inlined_call_operand.hbm [shape: f32[8,128], index: 7, kind: output, shape index: {}]  }
   0x1   :  { %13 = vsyncpa [#allocation6], 0 }
   0x2   :  { %14 = vsyncpa [#allocation9], 0  ;;  %s31_s26 = sshll.u32 %s460_s1, 4  ;;  %s32_s26 = int_to_ptr.hbm [resolvable:$true] %s31_s26 }
   0x3   :  { %15 = vsyncpa [#allocation4], 0  ;;  %s388_s27 = smov [#allocation5]   ;;  %s21_s8 = sshll.u32 %s459_s0, 4  ;;  %s22_s8 = int_to_ptr.hbm [resolvable:$true] %s21_s8 }
   0x4   :  { %s33_s28 = sshll.u32 %s388_s27, 4  ;;  %s389_s9 = smov 128   ;;  %s34_s28 = int_to_ptr.vmem [resolvable:$true] %s33_s28 }
   0x5   :  { %s390_s10 = smov 8   ;;  %s391_s11 = smov [#allocation2]  }
   0x6   :  { %39 = dma.hbm_to_vmem [thread:$0]  %s32_s26, 512, %s34_s28, [#allocation6], %s389_s9, %s389_s9, %s390_s10  }
   0x7   :  { %s23_s12 = sshll.u32 %s391_s11, 4  ;;  %s46_s15 = sshll.u32 %s462_s3, 4  ;;  %s24_s12 = int_to_ptr.vmem [resolvable:$true] %s23_s12  ;;  %s47_s15 = int_to_ptr.hbm [resolvable:$true] %s46_s15 }
   0x8   :  { %26 = dma.hbm_to_vmem [thread:$0]  %s22_s8, 128, %s24_s12, [#allocation3]  }
   0x9   :  { %s61_s17 = sshll.u32 %s464_s5, 4  ;;  %s392_s18 = smov [#allocation7]   ;;  %s62_s17 = int_to_ptr.hbm [resolvable:$true] %s61_s17 }
   0xa   :  { %s48_s19 = sshll.u32 %s392_s18, 4  ;;  %s393_s0 = smov [#allocation8]   ;;  %s49_s19 = int_to_ptr.vmem [resolvable:$true] %s48_s19 }
   0xb   :  { %54 = dma.hbm_to_vmem [thread:$0]  %s47_s15, 2048, %s49_s19, [#allocation6], %s389_s9, %s389_s9, %s390_s10  }
   0xc   :  { %s63_s20 = sshll.u32 %s393_s0, 4  ;;  %s64_s20 = int_to_ptr.vmem [resolvable:$true] %s63_s20 }
   0xd   :  { %69 = dma.hbm_to_vmem [thread:$0]  %s62_s17, 2048, %s64_s20, [#allocation9], %s389_s9, %s389_s9, %s390_s10  }
   0xe   :  { %380 = dma.done.wait [#allocation3], 128  }
   0xf   :  { %381 = vsyncadd [#allocation3], 4294967168 }
  0x10   :  { %382 = dma.done.wait [#allocation6], 2560  }
  0x11   :  { %383 = vsyncadd [#allocation6], 4294964736 }
  0x12   :  { %384 = dma.done.wait [#allocation9], 2048  }
  0x13   :  { %385 = vsyncadd [#allocation9], 4294965248  ;;  %v91_v0 = vld [vmem:[#allocation5 + $0x18] sm:$0xff]  ;;  %v90_v1 = vld [vmem:[#allocation5 + $0x10] sm:$0xff]  ;;  %vm131_vm0 = vcmask 261120   ;;  %s233_s26 = sshll.u32 %s466_s7, 4  ;;  %s234_s26 = int_to_ptr.hbm [resolvable:$true] %s233_s26 }
  0x14   :  { %147 = vmatpush.msra.mxu0 %v91_v0  ;;  %v108_v2 = vld [vmem:[#allocation7 + $0x78] sm:$0xff]  ;;  %v89_v3 = vld [vmem:[#allocation5 + $0x8] sm:$0xff]  ;;  %v107_v4 = vld [vmem:[#allocation7 + $0x70] sm:$0xff] }
  0x15   :  { %159 = vmatpush.msra.mxu1 %v108_v2  ;;  %v106_v5 = vld [vmem:[#allocation7 + $0x68] sm:$0xff]  ;;  %v88_v6 = vld [vmem:[#allocation5] sm:$0xff]  ;;  %v127_v7 = vld [vmem:[#allocation2] sm:$0xff] }
  0x16   :  { %148 = vmatpush.msra.mxu0 %v90_v1  ;;  %v105_v8 = vld [vmem:[#allocation7 + $0x60] sm:$0xff]  ;;  %v104_v9 = vld [vmem:[#allocation7 + $0x58] sm:$0xff]  ;;  %v103_v10 = vld [vmem:[#allocation7 + $0x50] sm:$0xff] }
  0x17   :  { %160 = vmatpush.msra.mxu1 %v107_v4  ;;  %v102_v11 = vld [vmem:[#allocation7 + $0x48] sm:$0xff]  ;;  %v101_v12 = vld [vmem:[#allocation7 + $0x40] sm:$0xff]  ;;  %v100_v13 = vld [vmem:[#allocation7 + $0x38] sm:$0xff] }
  0x18   :  { %149 = vmatpush.msra.mxu0 %v89_v3  ;;  %v99_v14 = vld [vmem:[#allocation7 + $0x30] sm:$0xff]  ;;  %v98_v15 = vld [vmem:[#allocation7 + $0x28] sm:$0xff]  ;;  %v97_v16 = vld [vmem:[#allocation7 + $0x20] sm:$0xff] }
  0x19   :  { %161 = vmatpush.msra.mxu1 %v106_v5  ;;  %v96_v17 = vld [vmem:[#allocation7 + $0x18] sm:$0xff]  ;;  %v95_v18 = vld [vmem:[#allocation7 + $0x10] sm:$0xff]  ;;  %v94_v19 = vld [vmem:[#allocation7 + $0x8] sm:$0xff] }
  0x1a   :  { %150 = vmatpush.msra.mxu0 %v88_v6  ;;  %v93_v20 = vld [vmem:[#allocation7] sm:$0xff]  ;;  %v125_v21 = vld [vmem:[#allocation8 + $0x78] sm:$0xff]  ;;  %v124_v22 = vld [vmem:[#allocation8 + $0x70] sm:$0xff] }
  0x1b   :  { %245 = vmatmul.msk.f32.vlgmr.msra.gmra.mxu0 %vm131_vm0, %v127_v7  ;;  %162 = vmatpush.msra.mxu1 %v105_v8  ;;  %v123_v23 = vld [vmem:[#allocation8 + $0x68] sm:$0xff]  ;;  %v122_v24 = vld [vmem:[#allocation8 + $0x60] sm:$0xff]  ;;  %v121_v25 = vld [vmem:[#allocation8 + $0x58] sm:$0xff] }
  0x1c   :  { %183 = vmatpush.msra.mxu2 %v125_v21  ;;  %v120_v26 = vld [vmem:[#allocation8 + $0x50] sm:$0xff]  ;;  %v119_v27 = vld [vmem:[#allocation8 + $0x48] sm:$0xff]  ;;  %v118_v28 = vld [vmem:[#allocation8 + $0x40] sm:$0xff] }
  0x1d   :  { %163 = vmatpush.msra.mxu1 %v104_v9  ;;  %v117_v29 = vld [vmem:[#allocation8 + $0x38] sm:$0xff]  ;;  %v116_v30 = vld [vmem:[#allocation8 + $0x30] sm:$0xff]  ;;  %v115_v31 = vld [vmem:[#allocation8 + $0x28] sm:$0xff] }
  0x1e   :  { %184 = vmatpush.msra.mxu2 %v124_v22  ;;  %v114_v32 = vld [vmem:[#allocation8 + $0x20] sm:$0xff]  ;;  %v113_v33 = vld [vmem:[#allocation8 + $0x18] sm:$0xff]  ;;  %v112_v38 = vld [vmem:[#allocation8 + $0x10] sm:$0xff] }
  0x1f   :  { %164 = vmatpush.msra.mxu1 %v103_v10  ;;  %v253_v34 = vld [vmem:[%s461_s2] ss:$0 sm:$0xff]  ;;  %v111_v39 = vld [vmem:[#allocation8 + $0x8] sm:$0xff]  ;;  %v110_v40 = vld [vmem:[#allocation8] sm:$0xff] }
  0x20   :  { %185 = vmatpush.msra.mxu2 %v123_v23  ;;  %v254_v41 = vld [vmem:[%s463_s4] ss:$0 sm:$0xff]  ;;  %s394_s4 = smov [#allocation10]  }
  0x21   :  { %165 = vmatpush.msra.mxu1 %v102_v11  ;;  %v255_v45 = vld [vmem:[%s465_s6] ss:$0 sm:$0xff]  ;;  %s231_s6 = sshll.u32 %s394_s4, 4  ;;  %s232_s6 = int_to_ptr.vmem [resolvable:$true] %s231_s6 }
  0x22   :  { %186 = vmatpush.msra.mxu2 %v122_v24 }
  0x23   :  { %166 = vmatpush.msra.mxu1 %v101_v12 }
  0x24   :  { %187 = vmatpush.msra.mxu2 %v121_v25 }
  0x25   :  { %167 = vmatpush.msra.mxu1 %v100_v13 }
  0x26   :  { %188 = vmatpush.msra.mxu2 %v120_v26 }
  0x27   :  { %168 = vmatpush.msra.mxu1 %v99_v14 }
  0x28   :  { %189 = vmatpush.msra.mxu2 %v119_v27 }
  0x29   :  { %169 = vmatpush.msra.mxu1 %v98_v15 }
  0x2a   :  { %190 = vmatpush.msra.mxu2 %v118_v28 }
  0x2b   :  { %170 = vmatpush.msra.mxu1 %v97_v16 }
  0x2c   :  { %191 = vmatpush.msra.mxu2 %v117_v29 }
  0x2d   :  { %171 = vmatpush.msra.mxu1 %v96_v17 }
  0x2e   :  { %192 = vmatpush.msra.mxu2 %v116_v30 }
  0x2f   :  { %172 = vmatpush.msra.mxu1 %v95_v18 }
  0x30   :  { %193 = vmatpush.msra.mxu2 %v115_v31 }
  0x31   :  { %173 = vmatpush.msra.mxu1 %v94_v19 }
  0x32   :  { %194 = vmatpush.msra.mxu2 %v114_v32 }
  0x33   :  { %174 = vmatpush.msra.mxu1 %v93_v20 }
  0x34   :  { %195 = vmatpush.msra.mxu2 %v113_v33 }
  0x36   :  { %196 = vmatpush.msra.mxu2 %v112_v38 }
  0x38   :  { %197 = vmatpush.msra.mxu2 %v111_v39 }
  0x3a   :  { %198 = vmatpush.msra.mxu2 %v110_v40 }
  0x98   :  { %v152_v35 = vpop.f32.mrf.mxu0 }
  0x99   :  { %v153_v36 = vadd.f32 %v253_v34, %v152_v35 }
  0x9b   :  { %v155_v37 = vmax.f32 %v153_v36, 0.0 }
  0x9d   :  { %175 = vmatmul.f32.vlgmr.msra.gmra.mxu1 %v155_v37 }
 0x11a   :  { %v176_v42 = vpop.f32.mrf.mxu1 }
 0x11b   :  { %v177_v43 = vadd.f32 %v254_v41, %v176_v42 }
 0x11d   :  { %v179_v44 = vmax.f32 %v177_v43, 0.0 }
 0x11f   :  { %199 = vmatmul.f32.vlgmr.msra.gmra.mxu2 %v179_v44 }
 0x1a2   :  { %v200_v46 = vpop.f32.mrf.mxu2 }
 0x1a3   :  { %v201_v47 = vadd.f32 %v255_v45, %v200_v46 }
 0x1a5   :  { %203 = vmax.xlane.f32.xlu0 %v201_v47 }
 0x218   :  { %v204_v48 = vpop.xlane.xlu0 %203 }
 0x219   :  { %v205_v49 = vsub.f32 %v201_v47, %v204_v48 }
 0x21b   :  { %v206_v50 = vmul.f32 1.442695, %v205_v49 }
 0x21d   :  { %256 = vpow2.f32 %v206_v50 }
 0x223   :  { %v257_v51 = vpop.eup %256 }
 0x224   :  { %208 = vadd.xlane.f32.xlu0 %v257_v51 }
 0x297   :  { %v209_v52 = vpop.xlane.xlu0 %208 }
 0x298   :  { %258 = vrcp.f32 %v209_v52  ;;  %v221_v56 = vand.u32 2147483648, %v209_v52  ;;  %v219_v58 = vand.u32 2147483647, %v209_v52  ;;  %vm215_vm2 = vweird.f32 %v209_v52 }
 0x29a   :  { %v222_v60 = vor.u32 1.1754944e-38, %v221_v56  ;;  %vm220_vm4 = vcmp.eq.f32.partialorder %v219_v58, 8.507059e+37 }
 0x29e   :  { %v259_v53 = vpop.eup %258 }
 0x29f   :  { %v211_v54 = vmul.f32 %v259_v53, %v209_v52  ;;  %vm216_vm1 = vweird.f32 %v259_v53 }
 0x2a0   :  { %vm217_vm3 = vmor %vm215_vm2, %vm216_vm1 }
 0x2a1   :  { %v212_v55 = vsub.f32 1.0, %v211_v54 }
 0x2a3   :  { %v213_v57 = vmul.f32 %v259_v53, %v212_v55 }
 0x2a5   :  { %v214_v59 = vadd.f32 %v259_v53, %v213_v57 }
 0x2a7   :  { %v218_v61 = vsel %vm217_vm3, %v259_v53, %v214_v59 }
 0x2a8   :  { %v223_v62 = vsel %vm220_vm4, %v222_v60, %v218_v61 }
 0x2a9   :  { %v224_v63 = vmul.f32 %v257_v51, %v223_v62 }
 0x2ab   :  { %225 = vst [vmem:[#allocation10] sm:$0xff] %v224_v63 }
 0x2ac   :  { %236 = dma.vmem_to_hbm [thread:$0]  %s232_s6, 128, %s234_s26, [#allocation4]  }
 0x2ad   :  { %386 = dma.done.wait [#allocation4], 128  }
 0x2ae   :  { %387 = vsyncadd [#allocation4], 4294967168 }
 0x2af   :  { %241 = vsyncpa [#allocation3], 1 }
 0x2b0   :  { %242 = vsyncpa [#allocation6], 1 }
 0x2b1   :  { %243 = vsyncpa [#allocation9], 1 }
 0x2b2   :  { %244 = vsyncpa [#allocation4], 1 }

</bundles_post_ra>
